<compile_context>
chip_gen: v5e
topology: v5e:2x2
jax: 0.10.0
libtpu: 0.0.40
codegen_flags: <defaults>
</compile_context>

<pallas_src>
import jax
import jax.numpy as jnp
from jax.experimental import pallas as pl
from jax.experimental.pallas import tpu as pltpu


# ---------------------------------------------------------------------------
# tiling helper
# ---------------------------------------------------------------------------
def _pick_tile(n, preferred):
    """Return `preferred` if it cleanly divides n, else the full extent."""
    if n <= preferred or n % preferred != 0:
        return n
    return preferred


# ---------------------------------------------------------------------------
# Kernel A: fused feature projection for both augmented views
#   H1 = x1 @ Wg,  H2 = x2 @ Wg      (bf16 out, f32 accumulation)
# ---------------------------------------------------------------------------
def _project_kernel(x1_ref, x2_ref, wg_ref, h1_ref, h2_ref):
    w = wg_ref[...]
    h1_ref[...] = jnp.dot(x1_ref[...], w,
                          preferred_element_type=jnp.float32).astype(h1_ref.dtype)
    h2_ref[...] = jnp.dot(x2_ref[...], w,
                          preferred_element_type=jnp.float32).astype(h2_ref.dtype)


def _project(x1, x2, wg, *, row_tile=256):
    N, n_in = x1.shape
    n_h = wg.shape[1]
    tm = _pick_tile(N, row_tile)
    return pl.pallas_call(
        _project_kernel,
        out_shape=(jax.ShapeDtypeStruct((N, n_h), jnp.bfloat16),
                   jax.ShapeDtypeStruct((N, n_h), jnp.bfloat16)),
        grid=(N // tm,),
        in_specs=[
            pl.BlockSpec((tm, n_in), lambda i: (i, 0)),   # x1 row tile
            pl.BlockSpec((tm, n_in), lambda i: (i, 0)),   # x2 row tile
            pl.BlockSpec((n_in, n_h), lambda i: (0, 0)),  # Wg (resident)
        ],
        out_specs=(pl.BlockSpec((tm, n_h), lambda i: (i, 0)),
                   pl.BlockSpec((tm, n_h), lambda i: (i, 0))),
        compiler_params=pltpu.CompilerParams(
            dimension_semantics=("parallel",)),
    )(x1, x2, wg)


# ---------------------------------------------------------------------------
# Kernel B: fused adjacency propagation + bias + PReLU + folded head
#   acc = adj @ [H1|H2]                     (tiled over rows and reduction)
#   act = PReLU(acc + [bg|bg])
#   z   = act @ W2 + b_sum                  (W2 = block-diag folded head)
# ---------------------------------------------------------------------------
def _prop_head_kernel(adj_ref, h_ref, bg2_ref, w2_ref, scalars_ref,
                      z_ref, acc_ref):
    k = pl.program_id(1)

    @pl.when(k == 0)
    def _():
        acc_ref[...] = jnp.zeros_like(acc_ref)

    acc_ref[...] += jnp.dot(adj_ref[...], h_ref[...],
                            preferred_element_type=jnp.float32)

    @pl.when(k == pl.num_programs(1) - 1)
    def _():
        alpha = scalars_ref[0]                  # PReLU slope  (SMEM scalar)
        b_sum = scalars_ref[1]                  # folded head bias (SMEM scalar)
        out = acc_ref[...] + bg2_ref[...]
        act = jnp.where(out > 0, out, alpha * out)              # PReLU
        z = jnp.dot(act.astype(w2_ref.dtype), w2_ref[...],
                    preferred_element_type=jnp.float32)
        z_ref[...] = z + b_sum


def _prop_head(adj, h, bg2, w2, scalars, *, row_tile=256, k_tile=512):
    N = adj.shape[0]
    two_nh = h.shape[1]
    tm = _pick_tile(N, row_tile)
    tk = _pick_tile(N, k_tile)
    return pl.pallas_call(
        _prop_head_kernel,
        out_shape=jax.ShapeDtypeStruct((N, 2), jnp.float32),
        grid=(N // tm, N // tk),
        in_specs=[
            pl.BlockSpec((tm, tk), lambda i, k: (i, k)),          # adj tile
            pl.BlockSpec((tk, two_nh), lambda i, k: (k, 0)),      # H tile
            pl.BlockSpec((1, two_nh), lambda i, k: (0, 0)),       # bias (2x)
            pl.BlockSpec((two_nh, 2), lambda i, k: (0, 0)),       # folded head W
            pl.BlockSpec(memory_space=pltpu.MemorySpace.SMEM),    # [alpha, b_sum]
        ],
        out_specs=pl.BlockSpec((tm, 2), lambda i, k: (i, 0)),
        scratch_shapes=[pltpu.VMEM((tm, two_nh), jnp.float32)],
        compiler_params=pltpu.CompilerParams(
            dimension_semantics=("parallel", "arbitrary")),
    )(adj, h, bg2, w2, scalars)


# ---------------------------------------------------------------------------
# Forward wrapper (matches DinkNet.forward, dense path, batch = 1)
# ---------------------------------------------------------------------------
def dinknet_forward(x_1, x_2, adj, params):
    """x_1, x_2: (1, N, n_in); adj: (1, N, N).  Returns logit: (2N,)."""
    wg, bg, alpha, wl, bl = params
    n_h = wg.shape[1]

    x1 = x_1[0].astype(jnp.bfloat16)
    x2 = x_2[0].astype(jnp.bfloat16)
    a = adj[0].astype(jnp.bfloat16)
    wg_b = wg.astype(jnp.bfloat16)

    # Fold Linear(n_h, n_h) + sum(1) into a matvec per view.
    w_sum = wl.sum(axis=1, keepdims=True)                    # (n_h, 1) f32
    b_sum = bl.sum()                                         # scalar  f32
    zeros = jnp.zeros_like(w_sum)
    w2 = jnp.concatenate(
        [jnp.concatenate([w_sum, zeros], axis=1),
         jnp.concatenate([zeros, w_sum], axis=1)], axis=0).astype(jnp.bfloat16)
    bg2 = jnp.concatenate([bg, bg], axis=1)                  # (1, 2*n_h) f32
    scalars = jnp.stack([alpha.reshape(()), b_sum]).astype(jnp.float32)

    h1, h2 = _project(x1, x2, wg_b)
    h = jnp.concatenate([h1, h2], axis=1)                    # (N, 2*n_h) bf16

    z = _prop_head(a, h, bg2, w2, scalars)                   # (N, 2) f32
    return jnp.concatenate([z[:, 0], z[:, 1]], axis=0)       # logit: (2N,)


# ---------------------------------------------------------------------------
# Pure-JAX f32 reference (mirrors the PyTorch module)
# ---------------------------------------------------------------------------
def _reference_forward(x_1, x_2, adj, params):
    wg, bg, alpha, wl, bl = params

    def gcn(x):
        h = x[0] @ wg
        out = adj[0] @ h + bg[0]
        return jnp.where(out > 0, out, alpha[0, 0] * out)

    def head(act):
        return (act @ wl + bl[0]).sum(axis=1)

    return jnp.concatenate([head(gcn(x_1)), head(gcn(x_2))], axis=0)


if __name__ == "__main__":
    key = jax.random.PRNGKey(0)
    N, n_in, n_h = 16, 32, 32          # small shapes; n_cluster unused in forward
    k = jax.random.split(key, 6)

    x_1 = jax.random.normal(k[0], (1, N, n_in), jnp.float32)
    x_2 = jax.random.normal(k[1], (1, N, n_in), jnp.float32)
    adj_raw = jax.random.uniform(k[2], (1, N, N), jnp.float32)
    adj = adj_raw / jnp.sum(adj_raw, axis=-1, keepdims=True)  # row-normalized adjacency

    # Deterministic parameter init (mirrors the PyTorch module's __init__):
    lim_g = (6.0 / (n_in + n_h)) ** 0.5                       # xavier_uniform_
    wg = jax.random.uniform(k[3], (n_in, n_h), jnp.float32, -lim_g, lim_g)
    bg = jnp.zeros((1, n_h), jnp.float32)                     # bias.data.fill_(0)
    alpha = jnp.full((1, 1), 0.25, jnp.float32)               # PReLU default slope
    lim_l = 1.0 / (n_h ** 0.5)                                # nn.Linear default init
    wl = jax.random.uniform(k[4], (n_h, n_h), jnp.float32, -lim_l, lim_l)
    bl = jax.random.uniform(k[5], (1, n_h), jnp.float32, -lim_l, lim_l)

    params = (wg, bg, alpha, wl, bl)

    fwd = jax.jit(dinknet_forward)
    logit = fwd(x_1, x_2, adj, params)
    jax.block_until_ready(logit)

    assert logit.shape == (2 * N,), logit.shape
    ref = _reference_forward(x_1, x_2, adj, params)
    # bf16 compute with f32 accumulation -> loosened tolerance vs f32 reference
    assert jnp.allclose(logit, ref, atol=5e-2, rtol=5e-2), \
        float(jnp.max(jnp.abs(logit - ref)))

    print("KERNEL_OK")
</pallas_src>

<mosaic_0001>
module attributes {stable_mosaic.version = 11 : i64} {
  func.func @_project_kernel(%arg0: i32, %arg1: memref<16x32xbf16, #tpu.memory_space<vmem>>, %arg2: memref<16x32xbf16, #tpu.memory_space<vmem>>, %arg3: memref<32x32xbf16, #tpu.memory_space<vmem>>, %arg4: memref<16x32xbf16, #tpu.memory_space<vmem>>, %arg5: memref<16x32xbf16, #tpu.memory_space<vmem>>) attributes {dimension_semantics = [#tpu.dimension_semantics<parallel>], iteration_bounds = array<i64: 1>, scalar_prefetch = 0 : i64, scratch_operands = 0 : i64, tpu.core_type = #tpu.core_type<tc>, window_params = [{transform_indices = @transform_0, window_bounds = array<i64: 16, 32>}, {transform_indices = @transform_1, window_bounds = array<i64: 16, 32>}, {pipeline_mode = #tpu.pipeline_mode<synchronous>, transform_indices = @transform_2, window_bounds = array<i64: 32, 32>}, {transform_indices = @transform_3, window_bounds = array<i64: 16, 32>}, {transform_indices = @transform_4, window_bounds = array<i64: 16, 32>}]} {
    %c0 = arith.constant 0 : index
    %c0_0 = arith.constant 0 : index
    %0 = vector.load %arg3[%c0, %c0_0] : memref<32x32xbf16, #tpu.memory_space<vmem>>, vector<32x32xbf16>
    %c0_1 = arith.constant 0 : index
    %c0_2 = arith.constant 0 : index
    %1 = vector.load %arg1[%c0_1, %c0_2] : memref<16x32xbf16, #tpu.memory_space<vmem>>, vector<16x32xbf16>
    %cst = arith.constant dense<0.000000e+00> : vector<16x32xf32>
    %2 = tpu.matmul %1, %0, %cst {dimension_numbers = #tpu.dot_dimension_numbers<[1], [0], [0], [1], [0, 0, 1, 1], [], []>} : vector<16x32xbf16>, vector<32x32xbf16>, vector<16x32xf32> -> vector<16x32xf32>
    %3 = arith.truncf %2 : vector<16x32xf32> to vector<16x32xbf16>
    %c0_3 = arith.constant 0 : index
    %c0_4 = arith.constant 0 : index
    %4 = vector.load %arg4[%c0_3, %c0_4] : memref<16x32xbf16, #tpu.memory_space<vmem>>, vector<16x32xbf16>
    tpu.vector_store %arg4[%c0_3, %c0_4], %3 {strides = array<i32>} : memref<16x32xbf16, #tpu.memory_space<vmem>>, vector<16x32xbf16>,
    %c0_5 = arith.constant 0 : index
    %c0_6 = arith.constant 0 : index
    %5 = vector.load %arg2[%c0_5, %c0_6] : memref<16x32xbf16, #tpu.memory_space<vmem>>, vector<16x32xbf16>
    %cst_7 = arith.constant dense<0.000000e+00> : vector<16x32xf32>
    %6 = tpu.matmul %5, %0, %cst_7 {dimension_numbers = #tpu.dot_dimension_numbers<[1], [0], [0], [1], [0, 0, 1, 1], [], []>} : vector<16x32xbf16>, vector<32x32xbf16>, vector<16x32xf32> -> vector<16x32xf32>
    %7 = arith.truncf %6 : vector<16x32xf32> to vector<16x32xbf16>
    %c0_8 = arith.constant 0 : index
    %c0_9 = arith.constant 0 : index
    %8 = vector.load %arg5[%c0_8, %c0_9] : memref<16x32xbf16, #tpu.memory_space<vmem>>, vector<16x32xbf16>
    tpu.vector_store %arg5[%c0_8, %c0_9], %7 {strides = array<i32>} : memref<16x32xbf16, #tpu.memory_space<vmem>>, vector<16x32xbf16>,
    return
  }
  func.func @transform_0(%arg0: i32) -> (i32, i32) {
    %c0_i32 = arith.constant 0 : i32
    %c0_i32_0 = arith.constant 0 : i32
    return %arg0, %c0_i32 : i32, i32
  }
  func.func @transform_1(%arg0: i32) -> (i32, i32) {
    %c0_i32 = arith.constant 0 : i32
    %c0_i32_0 = arith.constant 0 : i32
    return %arg0, %c0_i32 : i32, i32
  }
  func.func @transform_2(%arg0: i32) -> (i32, i32) {
    %c0_i32 = arith.constant 0 : i32
    %c0_i32_0 = arith.constant 0 : i32
    %c0_i32_1 = arith.constant 0 : i32
    return %c0_i32, %c0_i32_0 : i32, i32
  }
  func.func @transform_3(%arg0: i32) -> (i32, i32) {
    %c0_i32 = arith.constant 0 : i32
    %c0_i32_0 = arith.constant 0 : i32
    return %arg0, %c0_i32 : i32, i32
  }
  func.func @transform_4(%arg0: i32) -> (i32, i32) {
    %c0_i32 = arith.constant 0 : i32
    %c0_i32_0 = arith.constant 0 : i32
    return %arg0, %c0_i32 : i32, i32
  }
}

module attributes {stable_mosaic.version = 11 : i64} {
  func.func @_prop_head_kernel(%arg0: i32, %arg1: i32, %arg2: memref<16x16xbf16, #tpu.memory_space<vmem>>, %arg3: memref<16x64xbf16, #tpu.memory_space<vmem>>, %arg4: memref<1x64xf32, #tpu.memory_space<vmem>>, %arg5: memref<64x2xbf16, #tpu.memory_space<vmem>>, %arg6: memref<2xf32, #tpu.memory_space<smem>>, %arg7: memref<16x2xf32, #tpu.memory_space<vmem>>, %arg8: memref<16x64xf32, #tpu.memory_space<vmem>>) attributes {dimension_semantics = [#tpu.dimension_semantics<parallel>, #tpu.dimension_semantics<arbitrary>], iteration_bounds = array<i64: 1, 1>, scalar_prefetch = 0 : i64, scratch_operands = 1 : i64, tpu.core_type = #tpu.core_type<tc>, window_params = [{transform_indices = @transform_0, window_bounds = array<i64: 16, 16>}, {transform_indices = @transform_1, window_bounds = array<i64: 16, 64>}, {pipeline_mode = #tpu.pipeline_mode<synchronous>, transform_indices = @transform_2, window_bounds = array<i64: 1, 64>}, {pipeline_mode = #tpu.pipeline_mode<synchronous>, transform_indices = @transform_3, window_bounds = array<i64: 64, 2>}, {transform_indices = @transform_4, window_bounds = array<i64: 2>}, {transform_indices = @transform_5, window_bounds = array<i64: 16, 2>}]} {
    %c0_i32 = arith.constant 0 : i32
    %0 = arith.cmpi eq, %arg1, %c0_i32 : i32
    %1 = arith.extui %0 : i1 to i32
    %c0_i32_0 = arith.constant 0 : i32
    %2 = arith.cmpi ne, %1, %c0_i32_0 : i32
    scf.if %2 {
      %cst_10 = arith.constant 0.000000e+00 : f32
      %12 = vector.broadcast %cst_10 : f32 to vector<16x64xf32>
      %c0_11 = arith.constant 0 : index
      %c0_12 = arith.constant 0 : index
      %13 = vector.load %arg8[%c0_11, %c0_12] : memref<16x64xf32, #tpu.memory_space<vmem>>, vector<16x64xf32>
      tpu.vector_store %arg8[%c0_11, %c0_12], %12 {strides = array<i32>} : memref<16x64xf32, #tpu.memory_space<vmem>>, vector<16x64xf32>,
    } else {
    }
    %c0 = arith.constant 0 : index
    %c0_1 = arith.constant 0 : index
    %3 = vector.load %arg8[%c0, %c0_1] : memref<16x64xf32, #tpu.memory_space<vmem>>, vector<16x64xf32>
    %c0_2 = arith.constant 0 : index
    %c0_3 = arith.constant 0 : index
    %4 = vector.load %arg2[%c0_2, %c0_3] : memref<16x16xbf16, #tpu.memory_space<vmem>>, vector<16x16xbf16>
    %c0_4 = arith.constant 0 : index
    %c0_5 = arith.constant 0 : index
    %5 = vector.load %arg3[%c0_4, %c0_5] : memref<16x64xbf16, #tpu.memory_space<vmem>>, vector<16x64xbf16>
    %cst = arith.constant dense<0.000000e+00> : vector<16x64xf32>
    %6 = tpu.matmul %4, %5, %cst {dimension_numbers = #tpu.dot_dimension_numbers<[1], [0], [0], [1], [0, 0, 1, 1], [], []>} : vector<16x16xbf16>, vector<16x64xbf16>, vector<16x64xf32> -> vector<16x64xf32>
    %7 = arith.addf %3, %6 : vector<16x64xf32>
    %c0_6 = arith.constant 0 : index
    %c0_7 = arith.constant 0 : index
    %8 = vector.load %arg8[%c0_6, %c0_7] : memref<16x64xf32, #tpu.memory_space<vmem>>, vector<16x64xf32>
    tpu.vector_store %arg8[%c0_6, %c0_7], %7 {strides = array<i32>} : memref<16x64xf32, #tpu.memory_space<vmem>>, vector<16x64xf32>,
    %c0_i32_8 = arith.constant 0 : i32
    %9 = arith.cmpi eq, %arg1, %c0_i32_8 : i32
    %10 = arith.extui %9 : i1 to i32
    %c0_i32_9 = arith.constant 0 : i32
    %11 = arith.cmpi ne, %10, %c0_i32_9 : i32
    scf.if %11 {
      %c0_10 = arith.constant 0 : index
      %12 = memref.load %arg6[%c0_10] : memref<2xf32, #tpu.memory_space<smem>>
      %c1 = arith.constant 1 : index
      %13 = memref.load %arg6[%c1] : memref<2xf32, #tpu.memory_space<smem>>
      %c0_11 = arith.constant 0 : index
      %c0_12 = arith.constant 0 : index
      %14 = vector.load %arg8[%c0_11, %c0_12] : memref<16x64xf32, #tpu.memory_space<vmem>>, vector<16x64xf32>
      %c0_13 = arith.constant 0 : index
      %c0_14 = arith.constant 0 : index
      %15 = vector.load %arg4[%c0_13, %c0_14] : memref<1x64xf32, #tpu.memory_space<vmem>>, vector<1x64xf32>
      %16 = vector.broadcast %15 : vector<1x64xf32> to vector<16x64xf32>
      %17 = arith.addf %14, %16 : vector<16x64xf32>
      %cst_15 = arith.constant 0.000000e+00 : f32
      %18 = vector.broadcast %cst_15 : f32 to vector<16x64xf32>
      %19 = arith.cmpf ogt, %17, %18 : vector<16x64xf32>
      %20 = vector.broadcast %12 : f32 to vector<16x64xf32>
      %21 = arith.mulf %20, %17 : vector<16x64xf32>
      %22 = arith.select %19, %17, %21 : vector<16x64xi1>, vector<16x64xf32>
      %23 = arith.truncf %22 : vector<16x64xf32> to vector<16x64xbf16>
      %c0_16 = arith.constant 0 : index
      %c0_17 = arith.constant 0 : index
      %24 = vector.load %arg5[%c0_16, %c0_17] : memref<64x2xbf16, #tpu.memory_space<vmem>>, vector<64x2xbf16>
      %cst_18 = arith.constant dense<0.000000e+00> : vector<16x2xf32>
      %25 = tpu.matmul %23, %24, %cst_18 {dimension_numbers = #tpu.dot_dimension_numbers<[1], [0], [0], [1], [0, 0, 1, 1], [], []>} : vector<16x64xbf16>, vector<64x2xbf16>, vector<16x2xf32> -> vector<16x2xf32>
      %26 = vector.broadcast %13 : f32 to vector<16x2xf32>
      %27 = arith.addf %25, %26 : vector<16x2xf32>
      %c0_19 = arith.constant 0 : index
      %c0_20 = arith.constant 0 : index
      %28 = vector.load %arg7[%c0_19, %c0_20] : memref<16x2xf32, #tpu.memory_space<vmem>>, vector<16x2xf32>
      tpu.vector_store %arg7[%c0_19, %c0_20], %27 {strides = array<i32>} : memref<16x2xf32, #tpu.memory_space<vmem>>, vector<16x2xf32>,
    } else {
    }
    return
  }
  func.func @transform_0(%arg0: i32, %arg1: i32) -> (i32, i32) {
    %c0_i32 = arith.constant 0 : i32
    return %arg0, %arg1 : i32, i32
  }
  func.func @transform_1(%arg0: i32, %arg1: i32) -> (i32, i32) {
    %c0_i32 = arith.constant 0 : i32
    %c0_i32_0 = arith.constant 0 : i32
    return %arg1, %c0_i32 : i32, i32
  }
  func.func @transform_2(%arg0: i32, %arg1: i32) -> (i32, i32) {
    %c0_i32 = arith.constant 0 : i32
    %c0_i32_0 = arith.constant 0 : i32
    %c0_i32_1 = arith.constant 0 : i32
    return %c0_i32, %c0_i32_0 : i32, i32
  }
  func.func @transform_3(%arg0: i32, %arg1: i32) -> (i32, i32) {
    %c0_i32 = arith.constant 0 : i32
    %c0_i32_0 = arith.constant 0 : i32
    %c0_i32_1 = arith.constant 0 : i32
    return %c0_i32, %c0_i32_0 : i32, i32
  }
  func.func @transform_4(%arg0: i32, %arg1: i32) -> i32 {
    %c0_i32 = arith.constant 0 : i32
    %c0_i32_0 = arith.constant 0 : i32
    return %c0_i32 : i32
  }
  func.func @transform_5(%arg0: i32, %arg1: i32) -> (i32, i32) {
    %c0_i32 = arith.constant 0 : i32
    %c0_i32_0 = arith.constant 0 : i32
    return %arg0, %c0_i32 : i32, i32
  }
}

</mosaic_0001>

<bundles_post_ra>
// kernel: dinknet_forward.2
= control target key start
LH: loop header
LB: loop body
LE: loop exit
PB: predicated region body
PF: predicated region fallthrough
CT: control target
= control target key end

     0   :  { %vm40_vm0 = vcmask 261120   ;;  %vm60_vm1 = vcmask 257024   ;;  %s170_s2 = inlined_call_operand.vmem [shape: bf16[32,32], index: 2, kind: input, shape index: {}]   ;;  %s171_s0 = inlined_call_operand.vmem [shape: bf16[16,32], index: 0, kind: input, shape index: {}]   ;;  %s172_s1 = inlined_call_operand.vmem [shape: bf16[16,32], index: 1, kind: input, shape index: {}]   ;;  %s173_s3 = inlined_call_operand.vmem [shape: bf16[16,32], index: 3, kind: output, shape index: {0}]   ;;  %s174_s4 = inlined_call_operand.vmem [shape: bf16[16,32], index: 4, kind: output, shape index: {1}]  }
   0x1   :  { %v118_v0 = vld [vmem:[%s170_s2 + $0x8] sm:$0xff]  ;;  %v117_v1 = vld [vmem:[%s170_s2] sm:$0xff] }
   0x2   :  { %50 = vmatpush.bf16.msra.mxu0 %v118_v0  ;;  %79 = vmatpush.bf16.msra.mxu1 %v118_v0  ;;  %v119_v2 = vld [vmem:[%s171_s0] sm:$0xff] }
   0x3   :  { %v120_v3 = vld [vmem:[%s172_s1] sm:$0xff] }
   0x6   :  { %51 = vmatpush.bf16.msra.mxu0 %v117_v1  ;;  %80 = vmatpush.bf16.msra.mxu1 %v117_v1 }
   0x9   :  { %111 = vmatmul.msk.bf16.vlgmr.msra.gmra.mxu0 %vm40_vm0, %v119_v2  ;;  %116 = vmatmul.msk.bf16.vlgmr.msra.gmra.mxu1 %vm40_vm0, %v120_v3 }
  0x86   :  { %v53_v4 = vpop.f32.mrf.mxu0  ;;  %v82_v5 = vpop.f32.mrf.mxu1 }
  0x87   :  { %v58_v6 = vpack.c.bf16 %v53_v4, %v53_v4  ;;  %v87_v7 = vpack.c.bf16 %v82_v5, %v82_v5 }
  0x89   :  { %61 = vst.msk [vmem:[%s173_s3] sm:$0xf] %vm60_vm1, %v58_v6 }
  0x8a   :  { %89 = vst.msk [vmem:[%s174_s4] sm:$0xf] %vm60_vm1, %v87_v7 }
  0x8e   :  { %v55_v8 = vpop.f32.mrf.mxu0  ;;  %v84_v9 = vpop.f32.mrf.mxu1 }
  0x8f   :  { %v59_v10 = vpack.c.bf16 %v55_v8, %v55_v8  ;;  %v88_v11 = vpack.c.bf16 %v84_v9, %v84_v9 }
  0x91   :  { %62 = vst.msk [vmem:[%s173_s3 + $0x4] sm:$0xf] %vm60_vm1, %v59_v10 }
  0x92   :  { %90 = vst.msk [vmem:[%s174_s4 + $0x4] sm:$0xf] %vm60_vm1, %v88_v11 }

// kernel: dinknet_forward.3
= control target key start
LH: loop header
LB: loop body
LE: loop exit
PB: predicated region body
PF: predicated region fallthrough
CT: control target
= control target key end

     0   :  { %10 = vsyncpa [#allocation4], 0  ;;  %s210_s21 = smov [#allocation3]   ;;  %s277_s0 = inlined_call_operand.vmem [shape: bf16[16,16], index: 0, kind: input, shape index: {}]   ;;  %s278_s1 = inlined_call_operand.vmem [shape: bf16[16,64], index: 1, kind: input, shape index: {}]   ;;  %s279_s2 = inlined_call_operand.vmem [shape: f32[1,64], index: 2, kind: input, shape index: {}]   ;;  %s280_s3 = inlined_call_operand.vmem [shape: bf16[64,2], index: 3, kind: input, shape index: {}]   ;;  %s281_s4 = inlined_call_operand.vmem [shape: f32[2], index: 4, kind: input, shape index: {}]   ;;  %s282_s5 = inlined_call_operand.vmem [shape: f32[16,2], index: 5, kind: output, shape index: {}]  }
   0x1   :  { %s24_s20 = sshll.u32 %s281_s4, 4  ;;  %s25_s20 = int_to_ptr.vmem [resolvable:$true] %s24_s20 }
   0x2   :  { %27 = dma.vmem_to_smem %s25_s20, 16, %s210_s21, [#allocation4]  }
   0x3   :  { %208 = dma.done.wait [#allocation4], 16  }
   0x4   :  { %209 = vsyncadd [#allocation4], 4294967280 }
   0x5   :  { %32 = sfence }
   0x6   :  { %v188_v0 = vld [vmem:[%s278_s1] sm:$0xff]  ;;  %vm38_vm0 = vcmask 523264   ;;  %v211_v2 = vmov 0.0   ;;  %vm58_vm1 = vcmask 130048   ;;  %v192_v3 = vld [vmem:[%s280_s3 + $0x18] sm:$0xff]  ;;  %v191_v4 = vld [vmem:[%s280_s3 + $0x10] sm:$0xff] }
   0x7   :  { %v187_v1 = vld [vmem:[%s277_s0] sm:$0xff]  ;;  %39 = vst.msk [vmem:[#allocation2] sm:$0xff] %vm38_vm0, %v211_v2  ;;  %69 = vmatpush.bf16.msra.mxu0 %v188_v0  ;;  %142 = vmatpush.bf16.msra.mxu1 %v192_v3  ;;  %v190_v5 = vld [vmem:[%s280_s3 + $0x8] sm:$0xff]  ;;  %s84_s6 = sld [smem:[#allocation3]]  ;;  %vm152_vm4 = vcmask 15360  }
   0x8   :  { %40 = vst.msk [vmem:[#allocation2 + $0x8] sm:$0xff] %vm38_vm0, %v211_v2  ;;  %v189_v6 = vld [vmem:[%s280_s3] sm:$0xff]  ;;  %s169_s3 = sld [smem:[#allocation3 + $0x1]] }
   0x9   :  { %v195_v13 = vld [vmem:[%s279_s2] ss:$0 sm:$0xff] }
   0xa   :  { %168 = vmatmul.msk.bf16.vlgmr.msra.gmra.mxu0 %vm58_vm1, %v187_v1 }
   0xb   :  { %143 = vmatpush.bf16.msra.mxu1 %v191_v4 }
   0xd   :  { %v96_v16 = vstv %s84_s6 }
   0xe   :  { %v41_v7 = vld [vmem:[#allocation2] sm:$0xff]  ;;  %v110_v24 = vstv %s169_s3 }
   0xf   :  { %144 = vmatpush.bf16.msra.mxu1 %v190_v5  ;;  %v42_v10 = vld [vmem:[#allocation2 + $0x8] sm:$0xff] }
  0x13   :  { %145 = vmatpush.bf16.msra.mxu1 %v189_v6 }
  0x87   :  { %v71_v8 = vpop.f32.mrf.mxu0 }
  0x88   :  { %v76_v9 = vadd.f32 %v71_v8, %v41_v7 }
  0x8a   :  { %79 = vst.msk [vmem:[#allocation2] sm:$0xff] %vm38_vm0, %v76_v9 }
  0x8f   :  { %v73_v11 = vpop.f32.mrf.mxu0 }
  0x90   :  { %v77_v12 = vadd.f32 %v73_v11, %v42_v10 }
  0x91   :  { %v86_v14 = vld [vmem:[#allocation2] sm:$0xff] }
  0x92   :  { %80 = vst.msk [vmem:[#allocation2 + $0x8] sm:$0xff] %vm38_vm0, %v77_v12  ;;  %v92_v15 = vadd.f32 %v195_v13, %v86_v14 }
  0x94   :  { %v97_v19 = vmul.f32 %v96_v16, %v92_v15  ;;  %vm94_vm2 = vcmp.gt.f32.partialorder %v92_v15, 0.0 }
  0x96   :  { %v99_v21 = vsel %vm94_vm2, %v92_v15, %v97_v19 }
  0x99   :  { %v87_v17 = vld [vmem:[#allocation2 + $0x8] sm:$0xff] }
  0x9a   :  { %v93_v18 = vadd.f32 %v195_v13, %v87_v17 }
  0x9c   :  { %vm95_vm3 = vcmp.gt.f32.partialorder %v93_v18, 0.0  ;;  %v98_v20 = vmul.f32 %v96_v16, %v93_v18 }
  0x9e   :  { %v100_v22 = vsel %vm95_vm3, %v93_v18, %v98_v20 }
  0x9f   :  { %v101_v23 = vpack.c.bf16 %v100_v22, %v99_v21 }
  0xa1   :  { %186 = vmatmul.msk.bf16.vlgmr.msra.gmra.mxu1 %vm38_vm0, %v101_v23 }
 0x11e   :  { %v147_v25 = vpop.f32.mrf.mxu1 }
 0x11f   :  { %v148_v26 = vadd.f32 %v147_v25, %v110_v24 }
 0x121   :  { %153 = vst.msk [vmem:[%s282_s5] sm:$0xff] %vm152_vm4, %v148_v26 }
 0x126   :  { %v149_v27 = vpop.f32.mrf.mxu1 }
 0x127   :  { %v150_v28 = vadd.f32 %v149_v27, %v110_v24 }
 0x129   :  { %154 = vst.msk [vmem:[%s282_s5 + $0x8] sm:$0xff] %vm152_vm4, %v150_v28 }
 0x12a   :  { %159 = vsyncpa [#allocation4], 1 }

</bundles_post_ra>
